<compile_context>
chip_gen: v7x
topology: tpu7x:2x2x1
jax: 0.10.0
libtpu: 0.0.40
codegen_flags: <defaults>
</compile_context>

<pallas_src>
import functools

import jax
import jax.numpy as jnp
from jax import lax
from jax.experimental import pallas as pl
from jax.experimental.pallas import tpu as pltpu


def _round_up(x, m):
    return (x + m - 1) // m * m


def _plan(N, D, tile_m=None):
    """Pick padded sizes, destination-row tile and VMEM limit for this chip."""
    Dpad = _round_up(D, 128)
    Npad = _round_up(N, 128)

    try:  # per-generation budget: 128 MiB on v5e/v6e, 64 MiB on v7x
        cap = int(pltpu.get_tpu_info().vmem_capacity_bytes)
    except Exception:
        cap = 64 << 20  # conservative fallback (works on every generation)
    vmem_limit = int(min(cap - (16 << 20), 100 << 20))

    if tile_m is None:
        # Per grid step (bytes):
        #   streamed A row block (double-buffered):  2 * TM * Npad * 2
        #   resident x hi/lo (worst case 2 buffers): 2 * 2 * Npad * Dpad * 2
        #   outputs / inv_deg / intermediates:       small vs. the above
        resident = 2 * 2 * Npad * Dpad * 2
        slack = 4 << 20
        avail = max(vmem_limit - resident - slack, 2 * 128 * Npad * 2)
        tile_m = (avail // (2 * Npad * 2)) // 128 * 128
        tile_m = int(max(128, min(tile_m, 2048, Npad)))
        if Npad >= 256:  # keep >= 2 row tiles so v7x's 2 TensorCores both work
            tile_m = min(tile_m, (Npad // 2) // 128 * 128)
        while Npad % tile_m != 0:
            tile_m -= 128
    assert tile_m % 128 == 0 and Npad % tile_m == 0
    return Npad, Dpad, int(tile_m), vmem_limit


def prepare_graph(adj, Npad):
    """Static per-graph prep: bf16 padded adjacency + padded inverse degrees."""
    N = adj.shape[0]
    adj = adj.astype(jnp.float32)
    deg = jnp.sum(adj, axis=-1, keepdims=True)                       # (N, 1)
    inv_deg = jnp.where(deg > 0.0, 1.0 / deg, 0.0)                   # mean of 0 msgs -> 0
    adj_p = jnp.pad(adj.astype(jnp.bfloat16), ((0, Npad - N), (0, Npad - N)))
    inv_deg_p = jnp.pad(inv_deg, ((0, Npad - N), (0, 0)))
    return adj_p, inv_deg_p


def _split_bf16(x_f32):
    """Exact-ish bf16 hi/lo split: hi + lo == x to ~2^-18 relative."""
    hi = x_f32.astype(jnp.bfloat16)
    lo = (x_f32 - hi.astype(jnp.float32)).astype(jnp.bfloat16)
    return hi, lo


def _gcn1_kernel(adj_ref, xhi_ref, xlo_ref, invdeg_ref, x1hi_ref, x1lo_ref):
    # adj_ref: (TM, Npad) bf16 row block, fed to the MXU as-is (no cast copy).
    a = adj_ref[...]
    agg = jnp.dot(a, xhi_ref[...], preferred_element_type=jnp.float32)
    agg = agg + jnp.dot(a, xlo_ref[...], preferred_element_type=jnp.float32)
    x1 = invdeg_ref[...] * agg                       # (TM, Dpad) f32
    hi = x1.astype(jnp.bfloat16)
    x1hi_ref[...] = hi
    x1lo_ref[...] = (x1 - hi.astype(jnp.float32)).astype(jnp.bfloat16)


def _gcn2_mix_kernel(adj_ref, x1hi_ref, x1lo_ref, invdeg_ref, out_ref, *, tile_m):
    # Layer-2 mean aggregation fused with the cosine-similarity residual mix.
    a = adj_ref[...]
    agg = jnp.dot(a, x1hi_ref[...], preferred_element_type=jnp.float32)
    agg = agg + jnp.dot(a, x1lo_ref[...], preferred_element_type=jnp.float32)
    x2 = invdeg_ref[...] * agg                       # (TM, Dpad) f32

    # Rows of x1 for this tile, sliced from the resident hi/lo blocks (no HBM re-read).
    r0 = pl.multiple_of(pl.program_id(0) * tile_m, tile_m)
    x1 = (x1hi_ref[pl.ds(r0, tile_m), :].astype(jnp.float32)
          + x1lo_ref[pl.ds(r0, tile_m), :].astype(jnp.float32))

    # cosine_similarity(x2, x1, dim=-1) with torch eps = 1e-8:
    #   dot * rsqrt(max(ss1, eps^2)) * rsqrt(max(ss2, eps^2))   (EUP rsqrt)
    eps2 = jnp.float32(1e-8) * jnp.float32(1e-8)
    dot = jnp.sum(x1 * x2, axis=-1, keepdims=True)
    ss1 = jnp.sum(x1 * x1, axis=-1, keepdims=True)
    ss2 = jnp.sum(x2 * x2, axis=-1, keepdims=True)
    w = dot * lax.rsqrt(jnp.maximum(ss1, eps2)) * lax.rsqrt(jnp.maximum(ss2, eps2))

    out_ref[...] = w * x2 + (1.0 - w) * x1


def _forward_prepared(adj_p, inv_deg_p, features, *, N, D, Npad, Dpad, tile_m, vmem_limit):
    x = jnp.pad(features.astype(jnp.float32), ((0, Npad - N), (0, Dpad - D)))
    x_hi, x_lo = _split_bf16(x)

    grid = (Npad // tile_m,)
    compiler_params = pltpu.CompilerParams(
        dimension_semantics=("parallel",),   # independent row tiles (megacore-friendly)
        vmem_limit_bytes=vmem_limit,
    )

    a_spec = pl.BlockSpec((tile_m, Npad), lambda i: (i, 0))     # streamed A row block
    xres_spec = pl.BlockSpec((Npad, Dpad), lambda i: (0, 0))    # resident (constant map)
    deg_spec = pl.BlockSpec((tile_m, 1), lambda i: (i, 0))      # inv_deg row block
    row_spec = pl.BlockSpec((tile_m, Dpad), lambda i: (i, 0))   # lane-dense outputs

    # ---- pass 1: x1 = inv_deg * (A @ X), emitted as a bf16 hi/lo pair ----
    cost1 = pl.CostEstimate(
        flops=2 * 2 * Npad * Npad * Dpad,
        transcendentals=0,
        bytes_accessed=Npad * Npad * 2 + 4 * Npad * Dpad * 2 + Npad * 4,
    )
    x1_hi, x1_lo = pl.pallas_call(
        _gcn1_kernel,
        out_shape=(jax.ShapeDtypeStruct((Npad, Dpad), jnp.bfloat16),
                   jax.ShapeDtypeStruct((Npad, Dpad), jnp.bfloat16)),
        grid_spec=pltpu.PrefetchScalarGridSpec(
            num_scalar_prefetch=0,
            grid=grid,
            in_specs=[a_spec, xres_spec, xres_spec, deg_spec],
            out_specs=(row_spec, row_spec),
        ),
        compiler_params=compiler_params,
        cost_estimate=cost1,
    )(adj_p, x_hi, x_lo, inv_deg_p)

    # ---- pass 2: x2 = inv_deg * (A @ x1); out = w*x2 + (1-w)*x1 ----
    cost2 = pl.CostEstimate(
        flops=2 * 2 * Npad * Npad * Dpad + 12 * Npad * Dpad,
        transcendentals=2 * Npad,
        bytes_accessed=Npad * Npad * 2 + 2 * Npad * Dpad * 2 + Npad * Dpad * 4 + Npad * 4,
    )
    out_p = pl.pallas_call(
        functools.partial(_gcn2_mix_kernel, tile_m=tile_m),
        out_shape=jax.ShapeDtypeStruct((Npad, Dpad), jnp.float32),
        grid_spec=pltpu.PrefetchScalarGridSpec(
            num_scalar_prefetch=0,
            grid=grid,
            in_specs=[a_spec, xres_spec, xres_spec, deg_spec],
            out_specs=row_spec,
        ),
        compiler_params=compiler_params,
        cost_estimate=cost2,
    )(adj_p, x1_hi, x1_lo, inv_deg_p)

    return out_p[:N, :D]


def graph_gcn_forward(adj, features, *, tile_m=None):
    """adj: (N, N) dense 0/1 adjacency; features: (N, D) float32 node features."""
    N, D = features.shape
    assert adj.shape == (N, N)
    Npad, Dpad, tile_m, vmem_limit = _plan(N, D, tile_m)
    # Graph prep is static per graph; in a training loop call prepare_graph once
    # and reuse (adj_p, inv_deg_p) across forward calls.
    adj_p, inv_deg_p = prepare_graph(adj, Npad)
    return _forward_prepared(adj_p, inv_deg_p, features, N=N, D=D, Npad=Npad,
                             Dpad=Dpad, tile_m=tile_m, vmem_limit=vmem_limit)


def _reference(adj, features):
    hp = lax.Precision.HIGHEST
    deg = jnp.sum(adj, axis=-1, keepdims=True)
    inv_deg = jnp.where(deg > 0.0, 1.0 / deg, 0.0)
    x1 = inv_deg * jnp.dot(adj, features, precision=hp)
    x2 = inv_deg * jnp.dot(adj, x1, precision=hp)
    eps = 1e-8
    d = jnp.sum(x1 * x2, axis=-1, keepdims=True)
    n1 = jnp.sqrt(jnp.sum(x1 * x1, axis=-1, keepdims=True))
    n2 = jnp.sqrt(jnp.sum(x2 * x2, axis=-1, keepdims=True))
    w = d / (jnp.maximum(n1, eps) * jnp.maximum(n2, eps))
    return w * x2 + (1.0 - w) * x1


if __name__ == "__main__":
    N = 384   # number of graph nodes (small demo; 3 row tiles of 128)
    D = 64    # feature dim (in == hidden == out: the GCN layers own no weights)

    key = jax.random.PRNGKey(0)
    k_adj, k_feat = jax.random.split(key)

    # deterministic random sparse-ish binary adjacency (dense representation)
    adj = (jax.random.uniform(k_adj, (N, N)) < 0.15).astype(jnp.float32)
    features = jax.random.normal(k_feat, (N, D), dtype=jnp.float32)

    out = graph_gcn_forward(adj, features)
    out = jax.block_until_ready(out)

    ref = _reference(adj, features)
    assert out.shape == (N, D)
    # hi/lo bf16 split keeps the kernel within ~1e-5 of the f32 reference
    assert jnp.allclose(out, ref, atol=2e-4, rtol=2e-4)

    print("KERNEL_OK")
</pallas_src>

<mosaic_0001>
module attributes {stable_mosaic.version = 11 : i64} {
  func.func @_gcn1_kernel(%arg0: i32, %arg1: memref<128x384xbf16, #tpu.memory_space<vmem>>, %arg2: memref<384x128xbf16, #tpu.memory_space<vmem>>, %arg3: memref<384x128xbf16, #tpu.memory_space<vmem>>, %arg4: memref<128x1xf32, #tpu.memory_space<vmem>>, %arg5: memref<128x128xbf16, #tpu.memory_space<vmem>>, %arg6: memref<128x128xbf16, #tpu.memory_space<vmem>>) attributes {dimension_semantics = [#tpu.dimension_semantics<parallel>], iteration_bounds = array<i64: 3>, scalar_prefetch = 0 : i64, scratch_operands = 0 : i64, tpu.core_type = #tpu.core_type<tc>, window_params = [{transform_indices = @transform_0, window_bounds = array<i64: 128, 384>}, {pipeline_mode = #tpu.pipeline_mode<synchronous>, transform_indices = @transform_1, window_bounds = array<i64: 384, 128>}, {pipeline_mode = #tpu.pipeline_mode<synchronous>, transform_indices = @transform_2, window_bounds = array<i64: 384, 128>}, {transform_indices = @transform_3, window_bounds = array<i64: 128, 1>}, {transform_indices = @transform_4, window_bounds = array<i64: 128, 128>}, {transform_indices = @transform_5, window_bounds = array<i64: 128, 128>}]} {
    %c0 = arith.constant 0 : index
    %c0_0 = arith.constant 0 : index
    %0 = vector.load %arg1[%c0, %c0_0] : memref<128x384xbf16, #tpu.memory_space<vmem>>, vector<128x384xbf16>
    %c0_1 = arith.constant 0 : index
    %c0_2 = arith.constant 0 : index
    %1 = vector.load %arg2[%c0_1, %c0_2] : memref<384x128xbf16, #tpu.memory_space<vmem>>, vector<384x128xbf16>
    %cst = arith.constant dense<0.000000e+00> : vector<128x128xf32>
    %2 = tpu.matmul %0, %1, %cst {dimension_numbers = #tpu.dot_dimension_numbers<[1], [0], [0], [1], [0, 0, 1, 1], [], []>} : vector<128x384xbf16>, vector<384x128xbf16>, vector<128x128xf32> -> vector<128x128xf32>
    %c0_3 = arith.constant 0 : index
    %c0_4 = arith.constant 0 : index
    %3 = vector.load %arg3[%c0_3, %c0_4] : memref<384x128xbf16, #tpu.memory_space<vmem>>, vector<384x128xbf16>
    %cst_5 = arith.constant dense<0.000000e+00> : vector<128x128xf32>
    %4 = tpu.matmul %0, %3, %cst_5 {dimension_numbers = #tpu.dot_dimension_numbers<[1], [0], [0], [1], [0, 0, 1, 1], [], []>} : vector<128x384xbf16>, vector<384x128xbf16>, vector<128x128xf32> -> vector<128x128xf32>
    %5 = arith.addf %2, %4 : vector<128x128xf32>
    %c0_6 = arith.constant 0 : index
    %c0_7 = arith.constant 0 : index
    %6 = vector.load %arg4[%c0_6, %c0_7] : memref<128x1xf32, #tpu.memory_space<vmem>>, vector<128x1xf32>
    %7 = vector.broadcast %6 : vector<128x1xf32> to vector<128x128xf32>
    %8 = arith.mulf %7, %5 : vector<128x128xf32>
    %9 = arith.truncf %8 : vector<128x128xf32> to vector<128x128xbf16>
    %c0_8 = arith.constant 0 : index
    %c0_9 = arith.constant 0 : index
    %10 = vector.load %arg5[%c0_8, %c0_9] : memref<128x128xbf16, #tpu.memory_space<vmem>>, vector<128x128xbf16>
    tpu.vector_store %arg5[%c0_8, %c0_9], %9 {strides = array<i32>} : memref<128x128xbf16, #tpu.memory_space<vmem>>, vector<128x128xbf16>,
    %11 = arith.extf %9 : vector<128x128xbf16> to vector<128x128xf32>
    %12 = arith.subf %8, %11 : vector<128x128xf32>
    %13 = arith.truncf %12 : vector<128x128xf32> to vector<128x128xbf16>
    %c0_10 = arith.constant 0 : index
    %c0_11 = arith.constant 0 : index
    %14 = vector.load %arg6[%c0_10, %c0_11] : memref<128x128xbf16, #tpu.memory_space<vmem>>, vector<128x128xbf16>
    tpu.vector_store %arg6[%c0_10, %c0_11], %13 {strides = array<i32>} : memref<128x128xbf16, #tpu.memory_space<vmem>>, vector<128x128xbf16>,
    return
  }
  func.func @transform_0(%arg0: i32) -> (i32, i32) {
    %c0_i32 = arith.constant 0 : i32
    %c0_i32_0 = arith.constant 0 : i32
    return %arg0, %c0_i32 : i32, i32
  }
  func.func @transform_1(%arg0: i32) -> (i32, i32) {
    %c0_i32 = arith.constant 0 : i32
    %c0_i32_0 = arith.constant 0 : i32
    %c0_i32_1 = arith.constant 0 : i32
    return %c0_i32, %c0_i32_0 : i32, i32
  }
  func.func @transform_2(%arg0: i32) -> (i32, i32) {
    %c0_i32 = arith.constant 0 : i32
    %c0_i32_0 = arith.constant 0 : i32
    %c0_i32_1 = arith.constant 0 : i32
    return %c0_i32, %c0_i32_0 : i32, i32
  }
  func.func @transform_3(%arg0: i32) -> (i32, i32) {
    %c0_i32 = arith.constant 0 : i32
    %c0_i32_0 = arith.constant 0 : i32
    return %arg0, %c0_i32 : i32, i32
  }
  func.func @transform_4(%arg0: i32) -> (i32, i32) {
    %c0_i32 = arith.constant 0 : i32
    %c0_i32_0 = arith.constant 0 : i32
    return %arg0, %c0_i32 : i32, i32
  }
  func.func @transform_5(%arg0: i32) -> (i32, i32) {
    %c0_i32 = arith.constant 0 : i32
    %c0_i32_0 = arith.constant 0 : i32
    return %arg0, %c0_i32 : i32, i32
  }
}

</mosaic_0001>

<bundles_post_ra>
// kernel: tpu_custom_call.1
= control target key start
LH: loop header
LB: loop body
LE: loop exit
PB: predicated region body
PF: predicated region fallthrough
CT: control target
= control target key end

     0   :  { %11 = vsyncpa [#allocation3], 0  ;;  %s3025_s0 = inlined_call_operand.hbm [shape: bf16[384,384], index: 0, kind: input, shape index: {}]   ;;  %s3026_s1 = inlined_call_operand.vmem [shape: bf16[384,128], index: 1, kind: input, shape index: {}]   ;;  %s3027_s2 = inlined_call_operand.vmem [shape: bf16[384,128], index: 2, kind: input, shape index: {}]   ;;  %s3028_s3 = inlined_call_operand.vmem [shape: f32[384,1], index: 3, kind: input, shape index: {}]   ;;  %s3029_s4 = inlined_call_operand.hbm [shape: bf16[384,128], index: 4, kind: output, shape index: {0}]   ;;  %s3030_s5 = inlined_call_operand.hbm [shape: bf16[384,128], index: 5, kind: output, shape index: {1}]  }
   0x1   :  { %13 = vsyncpa [#allocation3 + $0x1], 0 }
   0x2   :  { %14 = vsyncpa [#allocation4], 0 }
   0x3   :  { %16 = vsyncpa [#allocation4 + $0x1], 0 }
   0x4   :  { %17 = vsyncpa [#allocation7], 0 }
   0x5   :  { %19 = vsyncpa [#allocation7 + $0x1], 0  ;;  %s2501_s18 = smov 0   ;;  %s2503_s19 = smov 0  }
   0x6   :  { %s2505_s20 = smov 0   ;;  %s2507_s21 = smov 0  }
   0x7 LB: > { %s2522_s22 = sadd.s32 4294967295, %s2461_s21   ;;  %s1669_s23 = sadd.s32 4294967294, %s2461_s21   ;;  %s2461_s21 = sphi %s2507_s21, %s3041_s21   ;;  %s2457_s20 = sphi %s2505_s20, %s3040_s20   ;;  %s2453_s19 = sphi %s2503_s19, %s3039_s19   ;;  %s2449_s18 = sphi %s2501_s18, %s3038_s18  }
   0x8   : > { %s2526_s24 = sadd.s32 1, %s2461_s21   ;;  %s32_s25 = sadd.s32 1, %s2457_s20 }
   0x9   : > { %s29_s26 = ssub.s32 %s2461_s21, %s2526_s24  ;;  %p39_p0 = scmp.ne.s32.totalorder %s2457_s20, %s2453_s19 }
   0xa   : > { %p30_p1 = scmp.eq.s32.totalorder %s29_s26, 0  ;;  %p40_p2 = scmp.eq.s32.totalorder %s2461_s21, 0 }
   0xb   : > { %p45_p3 = scmp.ne.s32.totalorder %s2453_s19, %s2449_s18  ;;  %p46_p4 = scmp.eq.s32.totalorder %s2522_s22, 0 }
   0xc   : > { %s2538_s27 = scalar_select %p30_p1, %s2457_s20, %s32_s25  }
   0xd   : > { %p41_p5 = por %p40_p2, %p39_p0  ;;  %p2540_p6 = por %p46_p4, %p45_p3 }
   0xe   : > { %p137_p7 = scmp.eq.s32.totalorder %s2522_s22, 2  ;;  %p143_p8 = scmp.eq.s32.totalorder %s1669_s23, 2 }
   0xf   : > { %p2212_p9 = scmp.lt.s32.totalorder %s2461_s21, 3  ;;  %s195_s6 = sand.u32 1, %s2457_s20  }
  0x10   : > { %p2546_p10 = por %p137_p7, %p39_p0  ;;  %p2550_p11 = por %p143_p8, %p45_p3 }
  0x11   : > { %s2193_s7 = smul.u32 3072, %s2461_s21  ;;  %p2561_p12 = pnand %p2212_p9, %p41_p5 }
  0x12   : > { %s3033_s29 = scalar_select %p2546_p10, 1, 0 }
  0x13   : > { %s3034_s30 = scalar_select %p2550_p11, 1, 0 }
  0x14   : > { %s2192_s8 = smul.u32 192, %s195_s6  ;;  %s2559_s11 = scalar_lea.hbm %s3025_s0, %s2193_s7 }
  0x15   : > { %s2567_s15 = scalar_lea.sflag [#allocation3], %s195_s6  ;;  %s2333_s16 = scalar_lea.hbm %s2559_s11, 3072 }
  0x16   : > { %s199_s13 = scalar_lea.vmem [#allocation2], %s2192_s8  ;;  %p2334_p13 = scmp.ne.s32.totalorder %s2559_s11, %s2333_s16 }
  0x17   : > { %s207_s14 = sshll.u32 %s199_s13, 4  ;;  %p2335_p0 = pneg %p2561_p12  ;;  %s2565_s14 = int_to_ptr.vmem [resolvable:$true] %s207_s14 }
  0x18   : > { %s2338_s25 = scalar_lea.hbm %s3025_s0, 9216  ;;  %p2339_p3 = scmp.lt.u32.totalorder %s2559_s11, %s3025_s0 }
  0x19   : > { %p2336_p1 = pnand %p2335_p0, %p2334_p13  ;;  %p2340_p4 = scmp.lt.u32.totalorder %s2338_s25, %s2333_s16 }
  0x1a   : > { %p2342_p7 = scmp.lt.u32.totalorder %s2333_s16, %s2559_s11 }
  0x1b   : > { %p2337_p2 = pneg %p2336_p1  ;;  %p2341_p5 = por %p2340_p4, %p2339_p3 }
  0x1d   : > { %p2343_p8 = por %p2342_p7, %p2341_p5 }
  0x1f   : > { %p2344_p9 = pnand %p2343_p8, %p2337_p2 }
  0x21   : > { %2347 = shalt.err (!%p2344_p9)
}
  0x22   : > { %s2348_s6 = scalar_lea.vmem %s2565_s14, 3072  ;;  %s2463_s8 = smov [#allocation2]  }
  0x23   : > { %p2349_p13 = scmp.ne.s32.totalorder %s2565_s14, %s2348_s6  ;;  %s2353_s9 = sshll.u32 %s2463_s8, 4  ;;  %s2354_s9 = int_to_ptr.vmem [resolvable:$false] %s2353_s9 }
  0x24   : > { %s2355_s10 = scalar_lea.vmem %s2354_s9, 6144  ;;  %p2356_p10 = scmp.lt.s32.totalorder %s2565_s14, %s2354_s9 }
  0x25   : > { %p2351_p1 = pnand %p2349_p13, %p2335_p0  ;;  %p2357_p3 = scmp.lt.s32.totalorder %s2355_s10, %s2348_s6 }
  0x27   : > { %p2352_p11 = pneg %p2351_p1  ;;  %p2358_p4 = por %p2357_p3, %p2356_p10 }
  0x29   : > { %p2359_p5 = pnand %p2358_p4, %p2352_p11 }
  0x2b   : > { %2362 = shalt.err (!%p2359_p5)
}
  0x2c   : > { %s2464_s13 = smov 192   ;;  %s2465_s16 = smov 12  }
  0x2d   : > { %2204 = dma.hbm_to_vmem [thread:$0]  (!%p2561_p12), %s2559_s11, 3072, %s2565_s14, %s2567_s15, %s2464_s13, %s2464_s13, %s2465_s16  }
  0x2e   : > { %p1675_p0 = scmp.ge.s32.totalorder %s2461_s21, 1  ;;  %p224_p2 = scmp.lt.s32.totalorder %s2461_s21, 4 }
  0x30   : > { %p225_p7 = pnand %p1675_p0, %p224_p2 }
  0x31   : > { %s2598_s17 = sand.u32 (!%p225_p7), 1, %s2453_s19  }
  0x32   : > { %228 = sbr.rel (%p225_p7) target bundleno = 444 (0x1bc), region = 36  ;;  %s231_s25 = scalar_lea.sflag (!%p225_p7), [#allocation3], %s2598_s17 }
  0x33   : > { %s2194_s23 = smul.u32 (!%p225_p7), 192, %s2598_s17 }
  0x35   : > { %s2602_s26 = scalar_lea.vmem (!%p225_p7), [#allocation2], %s2194_s23 }
  0x39   : > { %2436 = dma.done.wait (%p2540_p6), %s231_s25, 3072  }
  0x3a   : > { %2438 = vsyncadd (%p2540_p6), %s231_s25, 4294964224  ;;  %v2466_v0 = vmov 0   ;;  %v2253_v1 = vld [vmem:[%s3027_s2 + $0x40] sm:$0xff]   ;;  %v2257_v5 = vld [vmem:[%s3027_s2 + $0x48] sm:$0xff]   ;;  %s1678_s11 = sshll.u32 %s2522_s22, 4  ;;  %s1824_s6 = sshll.u32 %s2522_s22, 10 }
  0x3b   : > { %2252 = vset.pattern.permute.xlu1 %v2466_v0  ;;  %2251 = vset.pattern.permute.xlu0 %v2466_v0  ;;  %v2254_v2 = vld [vmem:[%s3027_s2] sm:$0xff]   ;;  %v2258_v6 = vld [vmem:[%s3027_s2 + $0x8] sm:$0xff]   ;;  %v2261_v9 = vld [vmem:[%s3027_s2 + $0x50] sm:$0xff]   ;;  %p273_p6 = scmp.lt.s32.totalorder %s1678_s11, 47  ;;  %s2933_s10 = scalar_lea.hbm %s3029_s4, %s1824_s6 }
  0x3c   : > { %1920 = vmatprep.subr.bf16.mxu0 %v2253_v1  ;;  %v2255_v3 = vld [vmem:[%s3026_s1 + $0x40] sm:$0xff]   ;;  %v2259_v7 = vld [vmem:[%s3026_s1 + $0x48] sm:$0xff]   ;;  %v2262_v10 = vld [vmem:[%s3027_s2 + $0x10] sm:$0xff]   ;;  %s1518_s16 = scalar_lea.sflag [#allocation4], %s2598_s17  ;;  %p3036_p11 = scmp.ne.s32.totalorder %s3033_s29, 0 }
  0x3d   : > { %1921 = vmatpush3.bf16.msra.mxu0 %v2254_v2  ;;  %v2256_v4 = vld [vmem:[%s3026_s1] sm:$0xff]   ;;  %2000 = vmatprep.subr.bf16.mxu1 %v2255_v3  ;;  %v2260_v8 = vld [vmem:[%s3026_s1 + $0x8] sm:$0xff]   ;;  %v2263_v11 = vld [vmem:[%s3026_s1 + $0x50] sm:$0xff]   ;;  %s3043_s11 = smov (!%p273_p6, %s1678_s11), 47 }
  0x3e   : > { %2001 = vmatpush3.bf16.msra.mxu1 %v2256_v4  ;;  %1922 = vmatprep.subr.bf16.mxu0 %v2257_v5  ;;  %v2264_v12 = vld [vmem:[%s3026_s1 + $0x10] sm:$0xff]   ;;  %v2265_v13 = vld [vmem:[%s3027_s2 + $0x58] sm:$0xff]   ;;  %v2269_v17 = vld [vmem:[%s3027_s2 + $0x60] sm:$0xff]   ;;  %s1679_s25 = sshll.u32 %s3043_s11, 3 }
  0x3f   : > { %2002 = vmatprep.subr.bf16.mxu1 %v2259_v7  ;;  %v2266_v14 = vld [vmem:[%s3027_s2 + $0x18] sm:$0xff]   ;;  %v2270_v18 = vld [vmem:[%s3027_s2 + $0x20] sm:$0xff]   ;;  %v2273_v21 = vld [vmem:[%s3027_s2 + $0x68] sm:$0xff]   ;;  %s2766_s15 = scalar_lea.vmem %s3028_s3, %s1679_s25  ;;  %s2467_s25 = smov [#allocation5]  }
  0x40   : > { %v2267_v15 = vld [vmem:[%s3026_s1 + $0x58] sm:$0xff]   ;;  %v2271_v19 = vld [vmem:[%s3026_s1 + $0x60] sm:$0xff]   ;;  %v2274_v22 = vld [vmem:[%s3027_s2 + $0x28] sm:$0xff]   ;;  %s2367_s12 = sshll.u32 %s2467_s25, 4  ;;  %s2368_s12 = int_to_ptr.vmem [resolvable:$false] %s2367_s12 }
  0x41   : > { %1923 = vmatpush3.bf16.msra.mxu0 %v2258_v6  ;;  %v2268_v16 = vld [vmem:[%s3026_s1 + $0x18] sm:$0xff]   ;;  %v2272_v20 = vld [vmem:[%s3026_s1 + $0x20] sm:$0xff]   ;;  %v2275_v23 = vld [vmem:[%s3026_s1 + $0x68] sm:$0xff]   ;;  %s2369_s14 = scalar_lea.vmem %s2368_s12, 2048 }
  0x42   : > { %2003 = vmatpush3.bf16.msra.mxu1 %v2260_v8  ;;  %1924 = vmatprep.subr.bf16.mxu0 %v2261_v9  ;;  %v2276_v24 = vld [vmem:[%s3026_s1 + $0x28] sm:$0xff]   ;;  %v2277_v25 = vld [vmem:[%s3027_s2 + $0x70] sm:$0xff]   ;;  %v2281_v29 = vld [vmem:[%s3027_s2 + $0x78] sm:$0xff]  }
  0x43   : > { %2004 = vmatprep.subr.bf16.mxu1 %v2263_v11  ;;  %v2278_v26 = vld [vmem:[%s3027_s2 + $0x30] sm:$0xff]   ;;  %v2282_v30 = vld [vmem:[%s3027_s2 + $0x38] sm:$0xff]   ;;  %v2284_v32 = vld [vmem:[%s2602_s26] ss:$12 sps:$4 sm:$0xff]  }
  0x44   : > { %v2279_v27 = vld [vmem:[%s3026_s1 + $0x70] sm:$0xff]   ;;  %v2283_v31 = vld [vmem:[%s3026_s1 + $0x78] sm:$0xff]   ;;  %v2288_v35 = vld [vmem:[%s3027_s2 + $0x80] sm:$0xff]  }
  0x45   : > { %1925 = vmatpush3.bf16.msra.mxu0 %v2262_v10  ;;  %v2280_v28 = vld [vmem:[%s3026_s1 + $0x30] sm:$0xff]   ;;  %v2287_v34 = vld [vmem:[%s3026_s1 + $0x38] sm:$0xff]   ;;  %v2289_v36 = vld [vmem:[%s3026_s1 + $0x80] sm:$0xff]  }
  0x46   : > { %2005 = vmatpush3.bf16.msra.mxu1 %v2264_v12  ;;  %1926 = vmatprep.subr.bf16.mxu0 %v2265_v13  ;;  %v2286_v33 = vld [vmem:[%s2602_s26 + $0x4] ss:$12 sps:$4 sm:$0xff]   ;;  %v2290_v37 = vld [vmem:[%s2602_s26 + $0x1c] ss:$12 sps:$4 sm:$0xff]   ;;  %v2295_v41 = vld [vmem:[%s2602_s26 + $0x34] ss:$12 sps:$4 sm:$0xff]  }
  0x47   : > { %2006 = vmatprep.subr.bf16.mxu1 %v2267_v15  ;;  %713 = vmatprep.mubr.bf16.mxu0 %v2286_v33  ;;  %v2293_v38 = vld [vmem:[%s3027_s2 + $0x88] sm:$0xff]   ;;  %v2292_v40 = vld [vmem:[%s2602_s26 + $0x18] ss:$12 sps:$4 sm:$0xff]   ;;  %v2298_v42 = vld [vmem:[%s3027_s2 + $0x90] sm:$0xff]  }
  0x48   : > { %1051 = vmatprep.mubr.bf16.mxu1 %v2286_v33  ;;  %v2294_v39 = vld [vmem:[%s3026_s1 + $0x88] sm:$0xff]   ;;  %v2299_v43 = vld [vmem:[%s3026_s1 + $0x90] sm:$0xff]   ;;  %v2303_v44 = vld [vmem:[%s3027_s2 + $0x98] sm:$0xff]  }
  0x49   : > { %1927 = vmatpush3.bf16.msra.mxu0 %v2266_v14  ;;  %v2304_v45 = vld [vmem:[%s3026_s1 + $0x98] sm:$0xff]   ;;  %v2308_v48 = vld [vmem:[%s3027_s2 + $0xa0] sm:$0xff]   ;;  %v2313_v50 = vld [vmem:[%s3027_s2 + $0xa8] sm:$0xff]  }
  0x4a   : > { %2007 = vmatpush3.bf16.msra.mxu1 %v2268_v16  ;;  %1928 = vmatprep.subr.bf16.mxu0 %v2269_v17  ;;  %v2297_v46 = vld [vmem:[%s2602_s26 + $0x30] ss:$12 sps:$4 sm:$0xff]   ;;  %v2300_v47 = vld [vmem:[%s2602_s26 + $0x4c] ss:$12 sps:$4 sm:$0xff]   ;;  %v2309_v49 = vld [vmem:[%s3026_s1 + $0xa0] sm:$0xff]  }
  0x4b   : > { %2008 = vmatprep.subr.bf16.mxu1 %v2271_v19  ;;  %v2314_v51 = vld [vmem:[%s3026_s1 + $0xa8] sm:$0xff]   ;;  %v2318_v52 = vld [vmem:[%s3027_s2 + $0xb0] sm:$0xff]   ;;  %v2323_v56 = vld [vmem:[%s3027_s2 + $0xb8] sm:$0xff]  }
  0x4c   : > { %v2302_v53 = vld [vmem:[%s2602_s26 + $0x48] ss:$12 sps:$4 sm:$0xff]   ;;  %v2305_v54 = vld [vmem:[%s2602_s26 + $0x64] ss:$12 sps:$4 sm:$0xff]   ;;  %v2324_v57 = vld [vmem:[%s3026_s1 + $0xb8] sm:$0xff]  }
  0x4d   : > { %1929 = vmatpush3.bf16.msra.mxu0 %v2270_v18  ;;  %v2319_v55 = vld [vmem:[%s3026_s1 + $0xb0] sm:$0xff]   ;;  %v2307_v58 = vld [vmem:[%s2602_s26 + $0x60] ss:$12 sps:$4 sm:$0xff]   ;;  %v2310_v59 = vld [vmem:[%s2602_s26 + $0x7c] ss:$12 sps:$4 sm:$0xff]  }
  0x4e   : > { %2009 = vmatpush3.bf16.msra.mxu1 %v2272_v20  ;;  %1930 = vmatprep.subr.bf16.mxu0 %v2273_v21  ;;  %v1215_v60 = vld [vmem:[%s2766_s15 + $0x10] sm:$0xff]  ;;  %v1213_v61 = vld [vmem:[%s2766_s15] sm:$0xff]  ;;  %v1216_v62 = vld [vmem:[%s2766_s15 + $0x18] sm:$0xff] }
  0x4f   : > { %2010 = vmatprep.subr.bf16.mxu1 %v2275_v23  ;;  %1241 = vperm.xlu1 %2252, %v1215_v60   ;;  %v1214_v63 = vld [vmem:[%s2766_s15 + $0x8] sm:$0xff]  ;;  %v2312_v0 = vld [vmem:[%s2602_s26 + $0x78] ss:$12 sps:$4 sm:$0xff]   ;;  %v2315_v1 = vld [vmem:[%s2602_s26 + $0x94] ss:$12 sps:$4 sm:$0xff]  }
  0x50   : > { %1231 = vperm.xlu0 %2251, %v1213_v61   ;;  %v1218_v2 = vld [vmem:[%s2766_s15 + $0x28] sm:$0xff]  ;;  %v1217_v3 = vld [vmem:[%s2766_s15 + $0x20] sm:$0xff]  ;;  %v1220_v4 = vld [vmem:[%s2766_s15 + $0x38] sm:$0xff] }
  0x51   : > { %1931 = vmatpush3.bf16.msra.mxu0 %v2274_v22  ;;  %v1219_v5 = vld [vmem:[%s2766_s15 + $0x30] sm:$0xff]  ;;  %v2320_v7 = vld [vmem:[%s2602_s26 + $0xac] ss:$12 sps:$4 sm:$0xff]   ;;  %v1221_v9 = vld [vmem:[%s2766_s15 + $0x40] sm:$0xff] }
  0x52   : > { %2011 = vmatpush3.bf16.msra.mxu1 %v2276_v24  ;;  %1932 = vmatprep.subr.bf16.mxu0 %v2277_v25  ;;  %v2317_v6 = vld [vmem:[%s2602_s26 + $0x90] ss:$12 sps:$4 sm:$0xff]   ;;  %v1222_v8 = vld [vmem:[%s2766_s15 + $0x48] sm:$0xff]  ;;  %v1225_v15 = vld [vmem:[%s2766_s15 + $0x60] sm:$0xff] }
  0x53   : > { %2012 = vmatprep.subr.bf16.mxu1 %v2279_v27  ;;  %1246 = vperm.xlu1 %2252, %v1216_v62   ;;  %v1224_v10 = vld [vmem:[%s2766_s15 + $0x58] sm:$0xff]  ;;  %v1223_v11 = vld [vmem:[%s2766_s15 + $0x50] sm:$0xff]  ;;  %v1226_v14 = vld [vmem:[%s2766_s15 + $0x68] sm:$0xff] }
  0x54   : > { %1236 = vperm.xlu0 %2251, %v1214_v63   ;;  %v2322_v12 = vld [vmem:[%s2602_s26 + $0xa8] ss:$12 sps:$4 sm:$0xff]   ;;  %v1228_v16 = vld [vmem:[%s2766_s15 + $0x78] sm:$0xff]  ;;  %v2326_v18 = vld [vmem:[%s2602_s26 + $0x20] ss:$12 sps:$4 sm:$0xff]  }
  0x55   : > { %1933 = vmatpush3.bf16.msra.mxu0 %v2278_v26  ;;  %v2325_v13 = vld [vmem:[%s2602_s26 + $0x8] ss:$12 sps:$4 sm:$0xff]   ;;  %v2327_v19 = vld [vmem:[%s2602_s26 + $0x38] ss:$12 sps:$4 sm:$0xff]   ;;  %v2328_v20 = vld [vmem:[%s2602_s26 + $0x50] ss:$12 sps:$4 sm:$0xff]  }
  0x56   : > { %2013 = vmatpush3.bf16.msra.mxu1 %v2280_v28  ;;  %1934 = vmatprep.subr.bf16.mxu0 %v2281_v29  ;;  %v1227_v17 = vld [vmem:[%s2766_s15 + $0x70] sm:$0xff]  ;;  %v2330_v22 = vld [vmem:[%s2602_s26 + $0x80] ss:$12 sps:$4 sm:$0xff]   ;;  %v2331_v23 = vld [vmem:[%s2602_s26 + $0x98] ss:$12 sps:$4 sm:$0xff]  }
  0x57   : > { %2014 = vmatprep.subr.bf16.mxu1 %v2283_v31  ;;  %1256 = vperm.xlu1 %2252, %v1218_v2   ;;  %v2329_v21 = vld [vmem:[%s2602_s26 + $0x68] ss:$12 sps:$4 sm:$0xff]   ;;  %v2332_v24 = vld [vmem:[%s2602_s26 + $0xb0] ss:$12 sps:$4 sm:$0xff]   ;;  %s1676_s26 = sshll.u32 %s2598_s17, 6 }
  0x58   : > { %1251 = vperm.xlu0 %2251, %v1217_v3   ;;  %s2885_s11 = scalar_lea.vmem [#allocation5], %s1676_s26  ;;  %s2899_s7 = scalar_lea.vmem [#allocation6], %s1676_s26 }
  0x59   : > { %1935 = vmatpush3.bf16.msra.mxu0 %v2282_v30  ;;  %s1536_s8 = sshll.u32 %s2885_s11, 4  ;;  %s1552_s13 = sshll.u32 %s2899_s7, 4  ;;  %s2935_s8 = int_to_ptr.vmem [resolvable:$true] %s1536_s8  ;;  %s2977_s13 = int_to_ptr.vmem [resolvable:$true] %s1552_s13 }
  0x5a   : > { %2015 = vmatpush3.bf16.msra.mxu1 %v2287_v34  ;;  %2080 = vmatprep.subr.bf16.mxu0 %v2288_v35  ;;  %s2363_s23 = scalar_lea.vmem %s2935_s8, 1024  ;;  %p2370_p9 = scmp.lt.s32.totalorder %s2935_s8, %s2368_s12 }
  0x5b   : > { %2112 = vmatprep.subr.bf16.mxu1 %v2289_v36  ;;  %1266 = vperm.xlu1 %2252, %v1220_v4   ;;  %p2364_p10 = scmp.ne.s32.totalorder %s2935_s8, %s2363_s23  ;;  %p2371_p13 = scmp.lt.s32.totalorder %s2369_s14, %s2363_s23 }
  0x5c   : > { %714 = vmatmul.mubr.bf16.vlgmr.msra.gmra.mrb[0].mxu0 %v2284_v32  ;;  %1261 = vperm.xlu0 %2251, %v1219_v5  }
  0x5d   : > { %2081 = vmatpush3.bf16.msra.mxu0 %v2288_v35  ;;  %1052 = vmatmul.mubr.bf16.vlgmr.msra.gmra.mrb[0].mxu1 %v2284_v32  ;;  %p2365_p12 = pnand %p2364_p10, %p3036_p11  ;;  %p2372_p1 = por %p2371_p13, %p2370_p9 }
  0x5e   : > { %721 = vmatprep.mubr.bf16.mxu0 %v2290_v37  ;;  %2113 = vmatpush3.bf16.msra.mxu1 %v2289_v36 }
  0x5f   : > { %2082 = vmatprep.subr.bf16.mxu0 %v2293_v38  ;;  %1059 = vmatprep.mubr.bf16.mxu1 %v2290_v37  ;;  %p2366_p8 = pneg %p2365_p12 }
  0x60   : > { %2114 = vmatprep.subr.bf16.mxu1 %v2294_v39  ;;  %1276 = vperm.xlu1 %2252, %v1222_v8  }
  0x61   : > { %2083 = vmatpush3.bf16.msra.mxu0 %v2293_v38  ;;  %1271 = vperm.xlu0 %2251, %v1221_v9   ;;  %p2373_p3 = pnand %p2372_p1, %p2366_p8 }
  0x62   : > { %2084 = vmatprep.subr.bf16.mxu0 %v2298_v42  ;;  %2115 = vmatpush3.bf16.msra.mxu1 %v2294_v39 }
  0x63   : > { %2116 = vmatprep.subr.bf16.mxu1 %v2299_v43 }
  0x64   : > { %722 = vmatmul.mubr.bf16.gmra.mrb[4].mxu0 %v2292_v40  ;;  %1286 = vperm.xlu1 %2252, %v1224_v10  }
  0x65   : > { %729 = vmatprep.mubr.bf16.mxu0 %v2295_v41  ;;  %2085 = vmatpush3.bf16.msra.mxu0 %v2298_v42 }
  0x66   : > { %1060 = vmatmul.mubr.bf16.gmra.mrb[4].mxu1 %v2292_v40  ;;  %2086 = vmatprep.subr.bf16.mxu0 %v2303_v44 }
  0x67   : > { %1067 = vmatprep.mubr.bf16.mxu1 %v2295_v41  ;;  %2117 = vmatpush3.bf16.msra.mxu1 %v2299_v43 }
  0x68   : > { %2118 = vmatprep.subr.bf16.mxu1 %v2304_v45  ;;  %1281 = vperm.xlu0 %2251, %v1223_v11  }
  0x69   : > { %2087 = vmatpush3.bf16.msra.mxu0 %v2303_v44  ;;  %1296 = vperm.xlu1 %2252, %v1226_v14  }
  0x6a   : > { %2088 = vmatprep.subr.bf16.mxu0 %v2308_v48 }
  0x6b   : > { %2119 = vmatpush3.bf16.msra.mxu1 %v2304_v45 }
  0x6c   : > { %730 = vmatmul.mubr.bf16.gmra.mrb[8].mxu0 %v2297_v46  ;;  %2120 = vmatprep.subr.bf16.mxu1 %v2309_v49 }
  0x6d   : > { %737 = vmatprep.mubr.bf16.mxu0 %v2300_v47  ;;  %2089 = vmatpush3.bf16.msra.mxu0 %v2308_v48 }
  0x6e   : > { %1068 = vmatmul.mubr.bf16.gmra.mrb[8].mxu1 %v2297_v46  ;;  %2090 = vmatprep.subr.bf16.mxu0 %v2313_v50 }
  0x6f   : > { %1075 = vmatprep.mubr.bf16.mxu1 %v2300_v47  ;;  %2121 = vmatpush3.bf16.msra.mxu1 %v2309_v49 }
  0x70   : > { %2122 = vmatprep.subr.bf16.mxu1 %v2314_v51  ;;  %1291 = vperm.xlu0 %2251, %v1225_v15  }
  0x71   : > { %2091 = vmatpush3.bf16.msra.mxu0 %v2313_v50  ;;  %1306 = vperm.xlu1 %2252, %v1228_v16  }
  0x72   : > { %2092 = vmatprep.subr.bf16.mxu0 %v2318_v52 }
  0x73   : > { %2123 = vmatpush3.bf16.msra.mxu1 %v2314_v51 }
  0x74   : > { %738 = vmatmul.mubr.bf16.gmra.mrb[12].mxu0 %v2302_v53  ;;  %2124 = vmatprep.subr.bf16.mxu1 %v2319_v55 }
  0x75   : > { %745 = vmatprep.mubr.bf16.mxu0 %v2305_v54  ;;  %2093 = vmatpush3.bf16.msra.mxu0 %v2318_v52 }
  0x76   : > { %1076 = vmatmul.mubr.bf16.gmra.mrb[12].mxu1 %v2302_v53  ;;  %2094 = vmatprep.subr.bf16.mxu0 %v2323_v56 }
  0x77   : > { %1083 = vmatprep.mubr.bf16.mxu1 %v2305_v54  ;;  %2125 = vmatpush3.bf16.msra.mxu1 %v2319_v55 }
  0x78   : > { %2126 = vmatprep.subr.bf16.mxu1 %v2324_v57  ;;  %1301 = vperm.xlu0 %2251, %v1227_v17  }
  0x79   : > { %2095 = vmatpush3.bf16.msra.mxu0 %v2323_v56 }
  0x7b   : > { %2127 = vmatpush3.bf16.msra.mxu1 %v2324_v57 }
  0x7c   : > { %746 = vmatmul.mubr.bf16.gmra.mrb[16].mxu0 %v2307_v58 }
  0x7d   : > { %753 = vmatprep.mubr.bf16.mxu0 %v2310_v59 }
  0x7e   : > { %1084 = vmatmul.mubr.bf16.gmra.mrb[16].mxu1 %v2307_v58 }
  0x7f   : > { %1091 = vmatprep.mubr.bf16.mxu1 %v2310_v59 }
  0x84   : > { %754 = vmatmul.mubr.bf16.gmra.mrb[20].mxu0 %v2312_v0 }
  0x85   : > { %761 = vmatprep.mubr.bf16.mxu0 %v2315_v1 }
  0x86   : > { %1092 = vmatmul.mubr.bf16.gmra.mrb[20].mxu1 %v2312_v0 }
  0x87   : > { %1099 = vmatprep.mubr.bf16.mxu1 %v2315_v1 }
  0x8c   : > { %762 = vmatmul.mubr.bf16.gmra.mrb[24].mxu0 %v2317_v6 }
  0x8d   : > { %769 = vmatprep.mubr.bf16.mxu0 %v2320_v7 }
  0x8e   : > { %1100 = vmatmul.mubr.bf16.gmra.mrb[24].mxu1 %v2317_v6 }
  0x8f   : > { %1107 = vmatprep.mubr.bf16.mxu1 %v2320_v7 }
  0x94   : > { %770 = vmatmul.mubr.bf16.gmra.mrb[28].mxu0 %v2322_v12 }
  0x95   : > { %2096 = vmatprep.mubr.bf16.mxu0 %v2325_v13 }
  0x96   : > { %1108 = vmatmul.mubr.bf16.gmra.mrb[28].mxu1 %v2322_v12 }
  0x97   : > { %2128 = vmatprep.mubr.bf16.mxu1 %v2325_v13 }
  0x9c   : > { %2097 = vmatmul.mubr.bf16.vlgmr.msra.gmra.mrb[32].mxu0 %v2326_v18 }
  0x9d   : > { %2100 = vmatprep.mubr.bf16.mxu0 %v2327_v19 }
  0x9e   : > { %2129 = vmatmul.mubr.bf16.vlgmr.msra.gmra.mrb[32].mxu1 %v2326_v18 }
  0x9f   : > { %2132 = vmatprep.mubr.bf16.mxu1 %v2327_v19 }
  0xa4   : > { %2101 = vmatmul.mubr.bf16.gmra.mrb[36].mxu0 %v2328_v20 }
  0xa5   : > { %2104 = vmatprep.mubr.bf16.mxu0 %v2329_v21 }
  0xa6   : > { %2133 = vmatmul.mubr.bf16.gmra.mrb[36].mxu1 %v2328_v20 }
  0xa7   : > { %2136 = vmatprep.mubr.bf16.mxu1 %v2329_v21 }
  0xac   : > { %2105 = vmatmul.mubr.bf16.gmra.mrb[40].mxu0 %v2330_v22 }
  0xad   : > { %2108 = vmatprep.mubr.bf16.mxu0 %v2331_v23 }
  0xae   : > { %2137 = vmatmul.mubr.bf16.gmra.mrb[40].mxu1 %v2330_v22 }
  0xaf   : > { %2140 = vmatprep.mubr.bf16.mxu1 %v2331_v23 }
  0xb4   : > { %2109 = vmatmul.mubr.bf16.gmra.mrb[44].mxu0 %v2332_v24 }
  0xb6   : > { %2141 = vmatmul.mubr.bf16.gmra.mrb[44].mxu1 %v2332_v24 }
 0x12f   : > { %v1936_v25 = vpop.f32.mrb[0].mxu0 }
 0x130   : > { %v1937_v26 = vpop.f32.mrb[1].mxu0  ;;  %v2016_v29 = vpop.f32.mrb[0].mxu1 }
 0x131   : > { %v2798_v27 = vadd.f32 %v1937_v26, %v1936_v25  ;;  %v1939_v28 = vpop.f32.mrb[2].mxu0  ;;  %v2017_v32 = vpop.f32.mrb[1].mxu1 }
 0x132   : > { %v1940_v30 = vpop.f32.mrb[3].mxu0  ;;  %v2802_v33 = vadd.f32 %v2017_v32, %v2016_v29  ;;  %v2019_v34 = vpop.f32.mrb[2].mxu1 }
 0x133   : > { %v2800_v31 = vadd.f32 %v1940_v30, %v1939_v28  ;;  %v2020_v35 = vpop.f32.mrb[3].mxu1 }
 0x134   : > { %v2804_v36 = vadd.f32 %v2020_v35, %v2019_v34 }
 0x137   : > { %v1942_v37 = vpop.f32.mrb[4].mxu0 }
 0x138   : > { %v1943_v38 = vpop.f32.mrb[5].mxu0 }
 0x139   : > { %v2806_v39 = vadd.f32 %v1943_v38, %v1942_v37  ;;  %v1945_v40 = vpop.f32.mrb[6].mxu0  ;;  %v2022_v41 = vpop.f32.mrb[4].mxu1 }
 0x13a   : > { %v1946_v42 = vpop.f32.mrb[7].mxu0  ;;  %v2023_v44 = vpop.f32.mrb[5].mxu1 }
 0x13b   : > { %v2808_v43 = vadd.f32 %v1946_v42, %v1945_v40  ;;  %v2810_v45 = vadd.f32 %v2023_v44, %v2022_v41  ;;  %v2025_v46 = vpop.f32.mrb[6].mxu1 }
 0x13c   : > { %v2026_v47 = vpop.f32.mrb[7].mxu1 }
 0x13d   : > { %v2812_v48 = vadd.f32 %v2026_v47, %v2025_v46  ;;  %v1242_v46 = vpop.permute.xlu1 %1241 }
 0x13f   : > { %v1948_v49 = vpop.f32.mrb[8].mxu0 }
 0x140   : > { %v1949_v50 = vpop.f32.mrb[9].mxu0 }
 0x141   : > { %v2814_v51 = vadd.f32 %v1949_v50, %v1948_v49  ;;  %v1951_v52 = vpop.f32.mrb[10].mxu0  ;;  %v2028_v53 = vpop.f32.mrb[8].mxu1 }
 0x142   : > { %v1952_v54 = vpop.f32.mrb[11].mxu0  ;;  %v2029_v56 = vpop.f32.mrb[9].mxu1 }
 0x143   : > { %v2816_v55 = vadd.f32 %v1952_v54, %v1951_v52  ;;  %v2818_v57 = vadd.f32 %v2029_v56, %v2028_v53  ;;  %v2031_v58 = vpop.f32.mrb[10].mxu1  ;;  %v1232_v53 = vpop.permute.xlu0 %1231 }
 0x144   : > { %v2032_v59 = vpop.f32.mrb[11].mxu1 }
 0x145   : > { %v2820_v60 = vadd.f32 %v2032_v59, %v2031_v58 }
 0x147   : > { %v1954_v61 = vpop.f32.mrb[12].mxu0 }
 0x148   : > { %v1955_v62 = vpop.f32.mrb[13].mxu0 }
 0x149   : > { %v2822_v63 = vadd.f32 %v1955_v62, %v1954_v61  ;;  %v1957_v0 = vpop.f32.mrb[14].mxu0  ;;  %v2034_v1 = vpop.f32.mrb[12].mxu1 }
 0x14a   : > { %v1958_v2 = vpop.f32.mrb[15].mxu0  ;;  %v2035_v4 = vpop.f32.mrb[13].mxu1 }
 0x14b   : > { %v2824_v3 = vadd.f32 %v1958_v2, %v1957_v0  ;;  %v2826_v5 = vadd.f32 %v2035_v4, %v2034_v1  ;;  %v2037_v6 = vpop.f32.mrb[14].mxu1  ;;  %v1247_v61 = vpop.permute.xlu1 %1246 }
 0x14c   : > { %v2038_v7 = vpop.f32.mrb[15].mxu1  ;;  %v1237_v4 = vpop.permute.xlu0 %1236 }
 0x14d   : > { %v2828_v8 = vadd.f32 %v2038_v7, %v2037_v6 }
 0x14f   : > { %v1960_v9 = vpop.f32.mrb[16].mxu0 }
 0x150   : > { %v1961_v10 = vpop.f32.mrb[17].mxu0 }
 0x151   : > { %v2830_v11 = vadd.f32 %v1961_v10, %v1960_v9  ;;  %v1963_v12 = vpop.f32.mrb[18].mxu0  ;;  %v2040_v13 = vpop.f32.mrb[16].mxu1 }
 0x152   : > { %v1964_v14 = vpop.f32.mrb[19].mxu0  ;;  %v2041_v16 = vpop.f32.mrb[17].mxu1 }
 0x153   : > { %v2832_v15 = vadd.f32 %v1964_v14, %v1963_v12  ;;  %v2834_v17 = vadd.f32 %v2041_v16, %v2040_v13  ;;  %v2043_v18 = vpop.f32.mrb[18].mxu1  ;;  %v2862_v14 = vpop.permute.xlu1 %1256 }
 0x154   : > { %v2044_v19 = vpop.f32.mrb[19].mxu1 }
 0x155   : > { %v2836_v20 = vadd.f32 %v2044_v19, %v2043_v18 }
 0x157   : > { %v1966_v21 = vpop.f32.mrb[20].mxu0 }
 0x158   : > { %v1967_v22 = vpop.f32.mrb[21].mxu0 }
 0x159   : > { %v2838_v23 = vadd.f32 %v1967_v22, %v1966_v21  ;;  %v1969_v24 = vpop.f32.mrb[22].mxu0  ;;  %v2046_v25 = vpop.f32.mrb[20].mxu1 }
 0x15a   : > { %v1970_v26 = vpop.f32.mrb[23].mxu0  ;;  %v2047_v29 = vpop.f32.mrb[21].mxu1 }
 0x15b   : > { %v2840_v28 = vadd.f32 %v1970_v26, %v1969_v24  ;;  %v2842_v30 = vadd.f32 %v2047_v29, %v2046_v25  ;;  %v2049_v32 = vpop.f32.mrb[22].mxu1  ;;  %v2865_v21 = vpop.permute.xlu0 %1251 }
 0x15c   : > { %v2050_v34 = vpop.f32.mrb[23].mxu1 }
 0x15d   : > { %v2844_v35 = vadd.f32 %v2050_v34, %v2049_v32 }
 0x15f   : > { %v1972_v37 = vpop.f32.mrb[24].mxu0 }
 0x160   : > { %v1973_v38 = vpop.f32.mrb[25].mxu0 }
 0x161   : > { %v2846_v40 = vadd.f32 %v1973_v38, %v1972_v37  ;;  %v1975_v41 = vpop.f32.mrb[26].mxu0  ;;  %v2052_v42 = vpop.f32.mrb[24].mxu1 }
 0x162   : > { %v1976_v44 = vpop.f32.mrb[27].mxu0  ;;  %v2053_v49 = vpop.f32.mrb[25].mxu1 }
 0x163   : > { %v2848_v47 = vadd.f32 %v1976_v44, %v1975_v41  ;;  %v2850_v50 = vadd.f32 %v2053_v49, %v2052_v42  ;;  %v2055_v52 = vpop.f32.mrb[26].mxu1  ;;  %v1267_v44 = vpop.permute.xlu1 %1266 }
 0x164   : > { %v2056_v54 = vpop.f32.mrb[27].mxu1 }
 0x165   : > { %v2852_v56 = vadd.f32 %v2056_v54, %v2055_v52  ;;  %v1262_v54 = vpop.permute.xlu0 %1261 }
 0x167   : > { %v1978_v58 = vpop.f32.mrb[28].mxu0 }
 0x168   : > { %v1979_v59 = vpop.f32.mrb[29].mxu0 }
 0x169   : > { %v2854_v62 = vadd.f32 %v1979_v59, %v1978_v58  ;;  %v1981_v0 = vpop.f32.mrb[30].mxu0  ;;  %v2058_v1 = vpop.f32.mrb[28].mxu1 }
 0x16a   : > { %v1982_v2 = vpop.f32.mrb[31].mxu0  ;;  %v2059_v7 = vpop.f32.mrb[29].mxu1 }
 0x16b   : > { %v2856_v6 = vadd.f32 %v1982_v2, %v1981_v0  ;;  %v2858_v9 = vadd.f32 %v2059_v7, %v2058_v1  ;;  %v2061_v10 = vpop.f32.mrb[30].mxu1 }
 0x16c   : > { %v2062_v12 = vpop.f32.mrb[31].mxu1 }
 0x16d   : > { %v2860_v13 = vadd.f32 %v2062_v12, %v2061_v10 }
 0x16f   : > { %v2098_v16 = vpop.f32.mrb[32].mxu0 }
 0x170   : > { %v821_v18 = vadd.f32 %v2098_v16, %v2806_v39  ;;  %v812_v19 = vpop.f32.mrb[33].mxu0 }
 0x171   : > { %v813_v22 = vadd.f32 %v2798_v27, %v812_v19  ;;  %v2099_v24 = vpop.f32.mrb[34].mxu0  ;;  %v2130_v29 = vpop.f32.mrb[32].mxu1 }
 0x172   : > { %v824_v25 = vadd.f32 %v2099_v24, %v2808_v43  ;;  %v1062_v26 = vadd.f32 %v2810_v45, %v821_v18  ;;  %v815_v32 = vpop.f32.mrb[35].mxu0  ;;  %v1150_v38 = vpop.f32.mrb[33].mxu1 }
 0x173   : > { %v816_v34 = vadd.f32 %v2800_v31, %v815_v32  ;;  %v1054_v37 = vadd.f32 %v2802_v33, %v813_v22  ;;  %v2131_v42 = vpop.f32.mrb[34].mxu1  ;;  %v2879_v19 = vpop.permute.xlu1 %1276 }
 0x174   : > { %v1159_v41 = vadd.f32 %v2130_v29, %v1062_v26  ;;  %v1065_v39 = vadd.f32 %v2812_v48, %v824_v25  ;;  %v1153_v52 = vpop.f32.mrb[35].mxu1  ;;  %v2889_v24 = vpop.permute.xlu0 %1271 }
 0x175   : > { %v1151_v49 = vadd.f32 %v1150_v38, %v1054_v37  ;;  %v1057_v27 = vadd.f32 %v2804_v36, %v816_v34 }
 0x176   : > { %v1162_v43 = vadd.f32 %v2131_v42, %v1065_v39  ;;  %v1311_v59 = vmul.f32 %v1242_v46, %v1159_v41 }
 0x177   : > { %v1154_v45 = vadd.f32 %v1153_v52, %v1057_v27  ;;  %v2102_v58 = vpop.f32.mrb[36].mxu0  ;;  %v1309_v1 = vmul.f32 %v1232_v53, %v1151_v49 }
 0x178   : > { %v1312_v0 = vmul.f32 %v1247_v61, %v1162_v43  ;;  %v837_v31 = vadd.f32 %v2102_v58, %v2822_v63  ;;  %v828_v33 = vpop.f32.mrb[37].mxu0 }
 0x179   : > { %v1310_v2 = vmul.f32 %v1237_v4, %v1154_v45  ;;  %v829_v48 = vadd.f32 %v2814_v51, %v828_v33  ;;  %v2103_v7 = vpop.f32.mrb[38].mxu0  ;;  %v2134_v16 = vpop.f32.mrb[36].mxu1 }
 0x17a   : > { %v1326_v10 = vpack.c.bf16 %v1312_v0, %v1311_v59  ;;  %v840_v36 = vadd.f32 %v2103_v7, %v2824_v3  ;;  %v1078_v12 = vadd.f32 %v2826_v5, %v837_v31  ;;  %v831_v18 = vpop.f32.mrb[39].mxu0  ;;  %v1166_v22 = vpop.f32.mrb[37].mxu1 }
 0x17b   : > { %v1325_v46 = vpack.c.bf16 %v1310_v2, %v1309_v1  ;;  %v832_v61 = vadd.f32 %v2816_v55, %v831_v18  ;;  %v1070_v63 = vadd.f32 %v2818_v57, %v829_v48  ;;  %v2135_v4 = vpop.f32.mrb[38].mxu1  ;;  %v1287_v45 = vpop.permute.xlu1 %1286 }
 0x17c   : > { %1906 = vst [vmem:[%s2885_s11 + $0x8] sm:$0xff] %v1326_v10   ;;  %v1407_v51 = vunpack.c.l.bf16 %v1326_v10  ;;  %v1408_v3 = vunpack.c.h.bf16 %v1326_v10  ;;  %v1175_v53 = vadd.f32 %v2134_v16, %v1078_v12  ;;  %v1081_v5 = vadd.f32 %v2828_v8, %v840_v36  ;;  %v1169_v29 = vpop.f32.mrb[39].mxu1 }
 0x17d   : > { %1830 = vst [vmem:[%s2885_s11] sm:$0xff] %v1325_v46   ;;  %v1405_v25 = vunpack.c.l.bf16 %v1325_v46  ;;  %v1406_v55 = vunpack.c.h.bf16 %v1325_v46  ;;  %v1167_v26 = vadd.f32 %v1166_v22, %v1070_v63  ;;  %v1073_v57 = vadd.f32 %v2820_v60, %v832_v61 }
 0x17e   : > { %v1423_v32 = vsub.f32 %v1311_v59, %v1407_v51  ;;  %v1424_v34 = vsub.f32 %v1312_v0, %v1408_v3  ;;  %v1178_v37 = vadd.f32 %v2135_v4, %v1081_v5  ;;  %v1315_v8 = vmul.f32 %v1262_v54, %v1175_v53 }
 0x17f   : > { %v1421_v38 = vsub.f32 %v1309_v1, %v1405_v25  ;;  %v1422_v41 = vsub.f32 %v1310_v2, %v1406_v55  ;;  %v1170_v39 = vadd.f32 %v1169_v29, %v1073_v57  ;;  %v2106_v42 = vpop.f32.mrb[40].mxu0  ;;  %v1313_v31 = vmul.f32 %v2865_v21, %v1167_v26  ;;  %v1282_v1 = vpop.permute.xlu0 %1281 }
 0x180   : > { %v1874_v49 = vpack.c.bf16 %v1424_v34, %v1423_v32  ;;  %v1316_v27 = vmul.f32 %v1267_v44, %v1178_v37  ;;  %v853_v52 = vadd.f32 %v2106_v42, %v2838_v23  ;;  %v844_v43 = vpop.f32.mrb[41].mxu0  ;;  %v1297_v5 = vpop.permute.xlu1 %1296 }
 0x181   : > { %v1869_v58 = vpack.c.bf16 %v1422_v41, %v1421_v38  ;;  %v1314_v60 = vmul.f32 %v2862_v14, %v1170_v39  ;;  %v845_v59 = vadd.f32 %v2830_v11, %v844_v43  ;;  %v2107_v0 = vpop.f32.mrb[42].mxu0  ;;  %v2138_v33 = vpop.f32.mrb[40].mxu1 }
 0x182   : > { %1913 = vst [vmem:[%s2899_s7 + $0x8] sm:$0xff] %v1874_v49   ;;  %v1328_v44 = vpack.c.bf16 %v1316_v27, %v1315_v8  ;;  %v856_v23 = vadd.f32 %v2107_v0, %v2840_v28  ;;  %v1094_v54 = vadd.f32 %v2842_v30, %v853_v52  ;;  %v847_v21 = vpop.f32.mrb[43].mxu0  ;;  %v1182_v48 = vpop.f32.mrb[41].mxu1 }
 0x183   : > { %1870 = vst [vmem:[%s2899_s7] sm:$0xff] %v1869_v58   ;;  %v1327_v14 = vpack.c.bf16 %v1314_v60, %v1313_v31  ;;  %v848_v11 = vadd.f32 %v2832_v15, %v847_v21  ;;  %v1086_v2 = vadd.f32 %v2834_v17, %v845_v59  ;;  %v2139_v28 = vpop.f32.mrb[42].mxu1  ;;  %v1292_v57 = vpop.permute.xlu0 %1291 }
 0x184   : > { %1908 = vst [vmem:[%s2885_s11 + $0x18] sm:$0xff] %v1328_v44   ;;  %v1411_v7 = vunpack.c.l.bf16 %v1328_v44  ;;  %v1412_v10 = vunpack.c.h.bf16 %v1328_v44  ;;  %v1191_v36 = vadd.f32 %v2138_v33, %v1094_v54  ;;  %v1097_v12 = vadd.f32 %v2844_v35, %v856_v23  ;;  %v1185_v61 = vpop.f32.mrb[43].mxu1  ;;  %v1307_v0 = vpop.permute.xlu1 %1306 }
 0x185   : > { %1907 = vst [vmem:[%s2885_s11 + $0x10] sm:$0xff] %v1327_v14   ;;  %v1409_v16 = vunpack.c.l.bf16 %v1327_v14  ;;  %v1410_v30 = vunpack.c.h.bf16 %v1327_v14  ;;  %v1183_v18 = vadd.f32 %v1182_v48, %v1086_v2  ;;  %v1089_v46 = vadd.f32 %v2836_v20, %v848_v11 }
 0x186   : > { %v1427_v63 = vsub.f32 %v1315_v8, %v1411_v7  ;;  %v1428_v22 = vsub.f32 %v1316_v27, %v1412_v10  ;;  %v1194_v15 = vadd.f32 %v2139_v28, %v1097_v12  ;;  %v1319_v25 = vmul.f32 %v1282_v1, %v1191_v36 }
 0x187   : > { %v1425_v51 = vsub.f32 %v1313_v31, %v1409_v16  ;;  %v1426_v17 = vsub.f32 %v1314_v60, %v1410_v30  ;;  %v1186_v3 = vadd.f32 %v1185_v61, %v1089_v46  ;;  %v2110_v53 = vpop.f32.mrb[44].mxu0  ;;  %v1317_v20 = vmul.f32 %v2889_v24, %v1183_v18  ;;  %v1302_v44 = vpop.permute.xlu0 %1301 }
 0x188   : > { %v1884_v4 = vpack.c.bf16 %v1428_v22, %v1427_v63  ;;  %v1320_v35 = vmul.f32 %v1287_v45, %v1194_v15  ;;  %v869_v55 = vadd.f32 %v2110_v53, %v2854_v62  ;;  %v860_v26 = vpop.f32.mrb[45].mxu0 }
 0x189   : > { %v1879_v29 = vpack.c.bf16 %v1426_v17, %v1425_v51  ;;  %v1318_v32 = vmul.f32 %v2879_v19, %v1186_v3  ;;  %v861_v34 = vadd.f32 %v2846_v40, %v860_v26  ;;  %v2111_v37 = vpop.f32.mrb[46].mxu0  ;;  %v2142_v42 = vpop.f32.mrb[44].mxu1 }
 0x18a   : > { %1915 = vst [vmem:[%s2899_s7 + $0x18] sm:$0xff] %v1884_v4   ;;  %v1330_v38 = vpack.c.bf16 %v1320_v35, %v1319_v25  ;;  %v872_v41 = vadd.f32 %v2111_v37, %v2856_v6  ;;  %v1110_v39 = vadd.f32 %v2858_v9, %v869_v55  ;;  %v863_v62 = vpop.f32.mrb[47].mxu0  ;;  %v1198_v27 = vpop.f32.mrb[45].mxu1 }
 0x18b   : > { %1914 = vst [vmem:[%s2899_s7 + $0x10] sm:$0xff] %v1879_v29   ;;  %v1329_v49 = vpack.c.bf16 %v1318_v32, %v1317_v20  ;;  %v864_v8 = vadd.f32 %v2848_v47, %v863_v62  ;;  %v1102_v24 = vadd.f32 %v2850_v50, %v861_v34  ;;  %v2143_v45 = vpop.f32.mrb[46].mxu1 }
 0x18c   : > { %1910 = vst [vmem:[%s2885_s11 + $0x28] sm:$0xff] %v1330_v38   ;;  %v1415_v19 = vunpack.c.l.bf16 %v1330_v38  ;;  %v1416_v40 = vunpack.c.h.bf16 %v1330_v38  ;;  %v1207_v52 = vadd.f32 %v2142_v42, %v1110_v39  ;;  %v1113_v43 = vadd.f32 %v2860_v13, %v872_v41  ;;  %v1201_v60 = vpop.f32.mrb[47].mxu1 }
 0x18d   : > { %1909 = vst [vmem:[%s2885_s11 + $0x20] sm:$0xff] %v1329_v49   ;;  %v1413_v6 = vunpack.c.l.bf16 %v1329_v49  ;;  %v1414_v9 = vunpack.c.h.bf16 %v1329_v49  ;;  %v1199_v58 = vadd.f32 %v1198_v27, %v1102_v24  ;;  %v1105_v31 = vadd.f32 %v2852_v56, %v864_v8 }
 0x18e   : > { %v1431_v47 = vsub.f32 %v1319_v25, %v1415_v19  ;;  %v1432_v50 = vsub.f32 %v1320_v35, %v1416_v40  ;;  %v1210_v59 = vadd.f32 %v2143_v45, %v1113_v43  ;;  %v1323_v21 = vmul.f32 %v1302_v44, %v1207_v52 }
 0x18f   : > { %v1429_v23 = vsub.f32 %v1317_v20, %v1413_v6  ;;  %v1430_v13 = vsub.f32 %v1318_v32, %v1414_v9  ;;  %v1202_v54 = vadd.f32 %v1201_v60, %v1105_v31  ;;  %v1321_v14 = vmul.f32 %v1292_v57, %v1199_v58 }
 0x190   : > { %v1894_v33 = vpack.c.bf16 %v1432_v50, %v1431_v47  ;;  %v1324_v1 = vmul.f32 %v1307_v0, %v1210_v59 }
 0x191   : > { %v1889_v56 = vpack.c.bf16 %v1430_v13, %v1429_v23  ;;  %v1322_v11 = vmul.f32 %v1297_v5, %v1202_v54 }
 0x192   : > { %1917 = vst [vmem:[%s2899_s7 + $0x28] sm:$0xff] %v1894_v33   ;;  %v1332_v2 = vpack.c.bf16 %v1324_v1, %v1323_v21 }
 0x193   : > { %1916 = vst [vmem:[%s2899_s7 + $0x20] sm:$0xff] %v1889_v56   ;;  %v1331_v48 = vpack.c.bf16 %v1322_v11, %v1321_v14 }
 0x194   : > { %1912 = vst [vmem:[%s2885_s11 + $0x38] sm:$0xff] %v1332_v2   ;;  %v1419_v7 = vunpack.c.l.bf16 %v1332_v2  ;;  %v1420_v10 = vunpack.c.h.bf16 %v1332_v2 }
 0x195   : > { %1911 = vst [vmem:[%s2885_s11 + $0x30] sm:$0xff] %v1331_v48   ;;  %v1417_v36 = vunpack.c.l.bf16 %v1331_v48  ;;  %v1418_v12 = vunpack.c.h.bf16 %v1331_v48 }
 0x196   : > { %v1435_v28 = vsub.f32 %v1323_v21, %v1419_v7  ;;  %v1436_v16 = vsub.f32 %v1324_v1, %v1420_v10 }
 0x197   : > { %2376 = shalt.err (!%p2373_p3)
}
 0x198   : > { %s2377_s15 = scalar_lea.hbm %s2933_s10, 1024  ;;  %s2381_s28 = scalar_lea.hbm %s3029_s4, 3072 }
 0x199   : > { %p2378_p4 = scmp.ne.s32.totalorder %s2933_s10, %s2377_s15  ;;  %p2382_p2 = scmp.lt.u32.totalorder %s2933_s10, %s3029_s4 }
 0x19a   : > { %p2383_p7 = scmp.lt.u32.totalorder %s2381_s28, %s2377_s15  ;;  %p2385_p10 = scmp.lt.u32.totalorder %s2377_s15, %s2933_s10 }
 0x19b   : > { %p2379_p5 = pnand %p2378_p4, %p3036_p11 }
 0x19c   : > { %p2384_p6 = por %p2383_p7, %p2382_p2 }
 0x19d   : > { %p2380_p0 = pneg %p2379_p5 }
 0x19e   : > { %p2386_p12 = por %p2385_p10, %p2384_p6 }
 0x1a0   : > { %p2387_p8 = pnand %p2386_p12, %p2380_p0 }
 0x1a2   : > { %2390 = shalt.err (!%p2387_p8)
}
 0x1a3   : > { %s2468_s23 = smov 64   ;;  %s2469_s12 = smov 4   ;;  %v1433_v30 = vsub.f32 %v1321_v14, %v1417_v36  ;;  %v1434_v18 = vsub.f32 %v1322_v11, %v1418_v12  ;;  %v1904_v46 = vpack.c.bf16 %v1436_v16, %v1435_v28 }
 0x1a4   : > { %2197 = dma.vmem_to_hbm [thread:$0]  (%p3036_p11), %s2935_s8, 1024, %s2933_s10, %s1518_s16, %s2468_s23, %s2468_s23, %s2469_s12  }
 0x1a5   : > { %v1899_v61 = vpack.c.bf16 %v1434_v18, %v1433_v30  ;;  %s2973_s26 = scalar_lea.hbm %s3030_s5, %s1824_s6  ;;  %1919 = vst [vmem:[%s2899_s7 + $0x38] sm:$0xff] %v1904_v46   ;;  %s1523_s11 = scalar_lea.sflag [#allocation7], %s2598_s17 }
 0x1a6   : > { %s2391_s8 = scalar_lea.vmem %s2977_s13, 1024  ;;  %s2470_s22 = smov [#allocation6]  }
 0x1a7   : > { %1918 = vst [vmem:[%s2899_s7 + $0x30] sm:$0xff] %v1899_v61   ;;  %p2392_p9 = scmp.ne.s32.totalorder %s2977_s13, %s2391_s8  ;;  %s2395_s10 = sshll.u32 %s2470_s22, 4  ;;  %s2396_s10 = int_to_ptr.vmem [resolvable:$false] %s2395_s10 }
 0x1a8   : > { %s2397_s16 = scalar_lea.vmem %s2396_s10, 2048  ;;  %p2398_p3 = scmp.lt.s32.totalorder %s2977_s13, %s2396_s10 }
 0x1a9   : > { %p2393_p13 = pnand %p2392_p9, %p3036_p11  ;;  %p2399_p4 = scmp.lt.s32.totalorder %s2397_s16, %s2391_s8 }
 0x1ab   : > { %p2394_p1 = pneg %p2393_p13  ;;  %p2400_p5 = por %p2399_p4, %p2398_p3 }
 0x1ad   : > { %p2401_p0 = pnand %p2400_p5, %p2394_p1 }
 0x1af   : > { %2404 = shalt.err (!%p2401_p0)
}
 0x1b0   : > { %s2405_s7 = scalar_lea.hbm %s2973_s26, 1024  ;;  %s2409_s9 = scalar_lea.hbm %s3030_s5, 3072 }
 0x1b1   : > { %p2406_p2 = scmp.ne.s32.totalorder %s2973_s26, %s2405_s7  ;;  %p2410_p10 = scmp.lt.u32.totalorder %s2973_s26, %s3030_s5 }
 0x1b2   : > { %p2411_p12 = scmp.lt.u32.totalorder %s2409_s9, %s2405_s7  ;;  %p2413_p9 = scmp.lt.u32.totalorder %s2405_s7, %s2973_s26 }
 0x1b3   : > { %p2407_p7 = pnand %p2406_p2, %p3036_p11 }
 0x1b4   : > { %p2412_p8 = por %p2411_p12, %p2410_p10 }
 0x1b5   : > { %p2408_p6 = pneg %p2407_p7 }
 0x1b6   : > { %p2414_p13 = por %p2413_p9, %p2412_p8 }
 0x1b8   : > { %p2415_p1 = pnand %p2414_p13, %p2408_p6 }
 0x1ba   : > { %2418 = shalt.err (!%p2415_p1)
}
 0x1bb   : > { %2198 = dma.vmem_to_hbm [thread:$0]  (%p3036_p11), %s2977_s13, 1024, %s2973_s26, %s1523_s11, %s2468_s23, %s2468_s23, %s2469_s12  }
 0x1bc PF: > { %p2213_p3 = scmp.ge.s32.totalorder %s2461_s21, 2  ;;  %s1567_s15 = sand.u32 1, %s2449_s18  }
 0x1bd   : > { %p3037_p4 = scmp.ne.s32.totalorder %s3034_s30, 0  ;;  %s1568_s8 = scalar_lea.sflag [#allocation4], %s1567_s15 }
 0x1bf   : > { %p2206_p5 = pnand %p2213_p3, %p3037_p4 }
 0x1c1   : > { %2440 = dma.done.wait (!%p2206_p5), %s1568_s8, 1024  }
 0x1c2   : > { %2442 = vsyncadd (!%p2206_p5), %s1568_s8, 4294966272  ;;  %s1577_s29 = scalar_lea.sflag [#allocation7], %s1567_s15 }
 0x1c3   : > { %2444 = dma.done.wait (!%p2206_p5), %s1577_s29, 1024  }
 0x1c4   : > { %2446 = vsyncadd (!%p2206_p5), %s1577_s29, 4294966272  ;;  %p22_p11 = scmp.ge.s32.totalorder %s2526_s24, 5   ;;  %s3038_s18 = smov %s2453_s19 }
 0x1c5   : > { %s3039_s19 = smov %s2457_s20  ;;  %s3040_s20 = smov %s2538_s27 }
 0x1c6   : > { %s3041_s21 = smov %s2526_s24  ;;  %24 = sbr.rel (!%p22_p11) target bundleno = 7 (0x7), region = 101 }
 0x1cd   :  { %1582 = vsyncpa [#allocation3], 1 }
 0x1ce   :  { %1584 = vsyncpa [#allocation3 + $0x1], 1 }
 0x1cf   :  { %1585 = vsyncpa [#allocation4], 1 }
 0x1d0   :  { %1587 = vsyncpa [#allocation4 + $0x1], 1 }
 0x1d1   :  { %1588 = vsyncpa [#allocation7], 1 }
 0x1d2   :  { %1590 = vsyncpa [#allocation7 + $0x1], 1 }

</bundles_post_ra>
